<compile_context>
chip_gen: v7x
topology: tpu7x:2x2x1
jax: 0.10.0
libtpu: 0.0.40
codegen_flags: <defaults>
</compile_context>

<pallas_src>
import functools

import jax
import jax.numpy as jnp
import numpy as np
from jax import lax
from jax.experimental import pallas as pl
from jax.experimental.pallas import tpu as pltpu

MODALITIES = 4
INDEXS = (0, 2)          # subset of modalities -> exercises the "index not in indexs" branch
IMG_H = 16
IMG_W = 16
BATCH = 2
LANES = 128


def _w1_pairs(indexs, modalities):
    """Ordered list of (index, m) pairs for which w1_{index}_{m} exists."""
    return [(idx, m) for idx in indexs for m in range(modalities) if m != idx]


def _sigmoid(z):
    # Exact identity sigmoid(z) = 0.5 * tanh(z/2) + 0.5: one EUP transcendental,
    # no divide, robust for large |z|.
    return 0.5 * jnp.tanh(0.5 * z) + 0.5


def fusion_kernel(x_ref, w1_ref, w2_ref, b2_ref, out_ref, *,
                  indexs, modalities, batch, hws):
    """All operands are 2-D lane-dense slabs:
         x_ref : (M*S, 128)   S = N*hws, modality-major then batch then spatial
         w1_ref: (n_w1*hws, 128)   natural size (NOT batch-broadcast)
         w2_ref: (M*hws, 128)
         b2_ref: (M*hws, 128)
         out   : (S, 128)
    """
    M = modalities
    N = batch
    nC = M - 1
    S = N * hws

    x_all = x_ref[...]                                    # (M*S, 128)
    x = [x_all[m * S:(m + 1) * S] for m in range(M)]

    # --- batch-expand w2/b2 once in VMEM (weights stay natural size in HBM) ---
    w2_rows = [w2_ref[m * hws:(m + 1) * hws] for m in range(M)]
    b2_rows = [b2_ref[m * hws:(m + 1) * hws] for m in range(M)]
    w2_t = jnp.concatenate([w2_rows[m] for m in range(M) for _ in range(N)], axis=0)
    b2_t = jnp.concatenate([b2_rows[m] for m in range(M) for _ in range(N)], axis=0)
    w2 = [w2_t[m * S:(m + 1) * S] for m in range(M)]      # (S,128) each

    # --- h = tanh(w2*x + b2): one stacked EUP issue over full (M*S,128) vregs ---
    h_all = jnp.tanh(x_all * w2_t + b2_t)
    h = [h_all[m * S:(m + 1) * S] for m in range(M)]

    # --- deduplicated global pair norms (scalar reductions, issued up front) ---
    needed = set()
    for index in indexs:
        for m in range(M):
            if m != index:
                needed.add(tuple(sorted((index, m))))
    inv_norm = {}
    for (a, b) in sorted(needed):
        d = h[a] - h[b]
        inv_norm[(a, b)] = lax.rsqrt(jnp.sum(d * d))      # 1 / ||h_a - h_b||_F

    # --- batch-invariant sigmoid gates: all pair logits stacked -> one tanh ---
    pairs = _w1_pairs(indexs, M)
    logits = jnp.concatenate(
        [w1_ref[r * hws:(r + 1) * hws] * inv_norm[tuple(sorted(p))]
         for r, p in enumerate(pairs)], axis=0)           # (n_w1*hws, 128)
    gates_small = _sigmoid(logits)
    gate = {}
    for r, p in enumerate(pairs):
        g = gates_small[r * hws:(r + 1) * hws]            # (hws,128), batch-invariant
        gate[p] = jnp.concatenate([g] * N, axis=0)        # tile over batch -> (S,128)

    C_acc = [None] * nC
    Pred_acc = [None] * nC

    for index in indexs:
        com = [(index, m) for m in range(M) if m != index]

        # Stacked softmax: one exp over the (2*nC*S,128) slab of shifted logits,
        # one exact divide over the stacked (2*S,128) denominators.
        add_l = [x[a] + x[b] for a, b in com]
        mul_l = [x[a] * x[b] for a, b in com]
        m_add = functools.reduce(jnp.maximum, add_l)
        m_mul = functools.reduce(jnp.maximum, mul_l)
        shifted = [l - m_add for l in add_l] + [l - m_mul for l in mul_l]
        e = jnp.exp(jnp.concatenate(shifted, axis=0))     # (2*nC*S, 128)
        e_add = [e[k * S:(k + 1) * S] for k in range(nC)]
        e_mul = [e[(nC + k) * S:(nC + k + 1) * S] for k in range(nC)]
        den = jnp.concatenate([functools.reduce(lambda u, v: u + v, e_add),
                               functools.reduce(lambda u, v: u + v, e_mul)], axis=0)
        inv = 1.0 / den                                   # exact (VALU has slack)
        inv_add = inv[:S]
        inv_mul = inv[S:]

        for k, (a, b) in enumerate(com):
            cur_A = e_add[k] * inv_add + e_mul[k] * inv_mul
            temp_c = gate[(a, b)] * x[b] * cur_A
            # softmax2d over the single channel x[index]*Pa == 1.0 for finite
            # inputs (softmax of one element), so it -- and Pa -- is elided.
            c_k = temp_c
            p_k = w2[index] * (temp_c + x[index])
            C_acc[k] = c_k if C_acc[k] is None else C_acc[k] + c_k
            Pred_acc[k] = p_k if Pred_acc[k] is None else Pred_acc[k] + p_k

    # Pred += w2_index * C for modalities not in indexs
    for index in range(M):
        if index not in indexs:
            for k in range(nC):
                Pred_acc[k] = Pred_acc[k] + w2[index] * C_acc[k]

    # tanh(mean over the channel (pair) dimension)
    mean_pred = functools.reduce(lambda u, v: u + v, Pred_acc)
    out_ref[...] = jnp.tanh(mean_pred * (1.0 / nC))


def fusion_forward(x_list, w1, w2, b2, *, indexs, modalities, img_h, img_w):
    """x_list: list of (N, 1, H, W) arrays; returns (N, 1, H, W)."""
    N = x_list[0].shape[0]
    M = modalities
    HW = img_h * img_w
    assert HW % LANES == 0, "toy sizes are chosen lane-aligned"
    hws = HW // LANES
    S = N * hws

    # Single stack+reshape for x (modality-major, then batch, then spatial).
    X = jnp.stack(x_list, axis=0).reshape(M * S, LANES)
    # Weights at natural size: only reshapes, no batch-broadcast materialization.
    w1f = w1.reshape(-1, LANES)     # (n_w1*hws, 128)
    w2f = w2.reshape(-1, LANES)     # (M*hws, 128)
    b2f = b2.reshape(-1, LANES)

    kernel = functools.partial(fusion_kernel, indexs=tuple(indexs),
                               modalities=M, batch=N, hws=hws)

    # TODO(synk): for realistic N/H/W switch to a gridded, pipelined design:
    # (T,128) blocks over the flattened batch*spatial dim, weight BlockSpecs
    # whose index_map ignores the batch grid axis, a prologue pass computing
    # the global pair norms fed via PrefetchScalarGridSpec scalar prefetch,
    # dimension_semantics=("parallel",) for the two v7x TensorCores, and a
    # <=56 MiB VMEM block budget on v7x (64 MiB physical).
    out = pl.pallas_call(
        kernel,
        out_shape=jax.ShapeDtypeStruct((S, LANES), jnp.float32),
        in_specs=[pl.BlockSpec(memory_space=pltpu.MemorySpace.VMEM)] * 4,
        out_specs=pl.BlockSpec(memory_space=pltpu.MemorySpace.VMEM),
    )(X, w1f, w2f, b2f)

    return out.reshape(N, 1, img_h, img_w)


def fusion_reference(x_list, w1, w2, b2, *, indexs, modalities, img_h, img_w):
    """Pure-JAX mirror of the PyTorch forward (NCHW), for verification."""
    M = modalities
    w1_map = {p: w1[r].reshape(1, 1, img_h, img_w)
              for r, p in enumerate(_w1_pairs(indexs, M))}
    w2_l = [w2[i].reshape(1, 1, img_h, img_w) for i in range(M)]
    b2_l = [b2[i].reshape(1, 1, img_h, img_w) for i in range(M)]

    def softmax2d(z):
        return jax.nn.softmax(z, axis=1)

    Pa = sum(x_list[i] for i in indexs)
    h = [jnp.tanh(w2_l[i] * x_list[i] + b2_l[i]) for i in range(M)]
    C_ls, Pred_ls = [], []
    for index in indexs:
        com = [(index, m) for m in range(M) if m != index]
        cur_A = softmax2d(jnp.concatenate([x_list[a] + x_list[b] for a, b in com], axis=1)) \
              + softmax2d(jnp.concatenate([x_list[a] * x_list[b] for a, b in com], axis=1))
        temp_C = jnp.concatenate(
            [jax.nn.sigmoid(w1_map[(a, b)] / jnp.linalg.norm(h[a] - h[b])) * x_list[b]
             for a, b in com], axis=1) * cur_A
        C_ls.append(temp_C * softmax2d(x_list[index] * Pa))
        Pred_ls.append(w2_l[index] * (temp_C + x_list[index]))
    C = sum(C_ls)
    Pred = sum(Pred_ls)
    for index in range(M):
        if index not in indexs:
            Pred = Pred + w2_l[index] * C
    return jnp.tanh(jnp.mean(Pred, axis=1, keepdims=True))


if __name__ == "__main__":
    key = jax.random.PRNGKey(0)
    keys = jax.random.split(key, MODALITIES)
    x_list = [jax.random.normal(keys[m], (BATCH, 1, IMG_H, IMG_W), dtype=jnp.float32)
              for m in range(MODALITIES)]

    HW = IMG_H * IMG_W
    n_w1 = len(_w1_pairs(INDEXS, MODALITIES))
    # Deterministic parameter init matching the module's __init__ (ones / zeros).
    w1 = jnp.ones((n_w1, HW), jnp.float32)
    w2 = jnp.ones((MODALITIES, HW), jnp.float32)
    b2 = jnp.zeros((MODALITIES, HW), jnp.float32)

    out = fusion_forward(x_list, w1, w2, b2, indexs=INDEXS,
                         modalities=MODALITIES, img_h=IMG_H, img_w=IMG_W)
    out = jax.block_until_ready(out)

    ref = fusion_reference(x_list, w1, w2, b2, indexs=INDEXS,
                           modalities=MODALITIES, img_h=IMG_H, img_w=IMG_W)

    assert out.shape == (BATCH, 1, IMG_H, IMG_W)
    np.testing.assert_allclose(np.asarray(out), np.asarray(ref), rtol=1e-3, atol=1e-3)
    print("KERNEL_OK")
</pallas_src>

<mosaic_0001>
module attributes {stable_mosaic.version = 11 : i64} {
  func.func @fusion_kernel(%arg0: memref<16x128xf32, #tpu.memory_space<vmem>>, %arg1: memref<12x128xf32, #tpu.memory_space<vmem>>, %arg2: memref<8x128xf32, #tpu.memory_space<vmem>>, %arg3: memref<8x128xf32, #tpu.memory_space<vmem>>, %arg4: memref<4x128xf32, #tpu.memory_space<vmem>>) attributes {dimension_semantics = [], scalar_prefetch = 0 : i64, scratch_operands = 0 : i64, tpu.core_type = #tpu.core_type<tc>} {
    %c0 = arith.constant 0 : index
    %c0_0 = arith.constant 0 : index
    %0 = vector.load %arg0[%c0, %c0_0] : memref<16x128xf32, #tpu.memory_space<vmem>>, vector<16x128xf32>
    %1 = vector.extract_strided_slice %0 {offsets = [0, 0], sizes = [4, 128], strides = [1, 1]} : vector<16x128xf32> to vector<4x128xf32>
    %2 = vector.extract_strided_slice %0 {offsets = [4, 0], sizes = [4, 128], strides = [1, 1]} : vector<16x128xf32> to vector<4x128xf32>
    %3 = vector.extract_strided_slice %0 {offsets = [8, 0], sizes = [4, 128], strides = [1, 1]} : vector<16x128xf32> to vector<4x128xf32>
    %4 = vector.extract_strided_slice %0 {offsets = [12, 0], sizes = [4, 128], strides = [1, 1]} : vector<16x128xf32> to vector<4x128xf32>
    %c0_1 = arith.constant 0 : index
    %c0_2 = arith.constant 0 : index
    %5 = vector.load %arg2[%c0_1, %c0_2] : memref<8x128xf32, #tpu.memory_space<vmem>>, vector<2x128xf32>
    %c2 = arith.constant 2 : index
    %c0_3 = arith.constant 0 : index
    %6 = vector.load %arg2[%c2, %c0_3] : memref<8x128xf32, #tpu.memory_space<vmem>>, vector<2x128xf32>
    %c4 = arith.constant 4 : index
    %c0_4 = arith.constant 0 : index
    %7 = vector.load %arg2[%c4, %c0_4] : memref<8x128xf32, #tpu.memory_space<vmem>>, vector<2x128xf32>
    %c6 = arith.constant 6 : index
    %c0_5 = arith.constant 0 : index
    %8 = vector.load %arg2[%c6, %c0_5] : memref<8x128xf32, #tpu.memory_space<vmem>>, vector<2x128xf32>
    %c0_6 = arith.constant 0 : index
    %c0_7 = arith.constant 0 : index
    %9 = vector.load %arg3[%c0_6, %c0_7] : memref<8x128xf32, #tpu.memory_space<vmem>>, vector<2x128xf32>
    %c2_8 = arith.constant 2 : index
    %c0_9 = arith.constant 0 : index
    %10 = vector.load %arg3[%c2_8, %c0_9] : memref<8x128xf32, #tpu.memory_space<vmem>>, vector<2x128xf32>
    %c4_10 = arith.constant 4 : index
    %c0_11 = arith.constant 0 : index
    %11 = vector.load %arg3[%c4_10, %c0_11] : memref<8x128xf32, #tpu.memory_space<vmem>>, vector<2x128xf32>
    %c6_12 = arith.constant 6 : index
    %c0_13 = arith.constant 0 : index
    %12 = vector.load %arg3[%c6_12, %c0_13] : memref<8x128xf32, #tpu.memory_space<vmem>>, vector<2x128xf32>
    %13 = tpu.concatenate %5, %5, %6, %6, %7, %7, %8, %8 in 0 : vector<2x128xf32>, vector<2x128xf32>, vector<2x128xf32>, vector<2x128xf32>, vector<2x128xf32>, vector<2x128xf32>, vector<2x128xf32>, vector<2x128xf32> -> vector<16x128xf32>
    %14 = tpu.concatenate %9, %9, %10, %10, %11, %11, %12, %12 in 0 : vector<2x128xf32>, vector<2x128xf32>, vector<2x128xf32>, vector<2x128xf32>, vector<2x128xf32>, vector<2x128xf32>, vector<2x128xf32>, vector<2x128xf32> -> vector<16x128xf32>
    %15 = vector.extract_strided_slice %13 {offsets = [0, 0], sizes = [4, 128], strides = [1, 1]} : vector<16x128xf32> to vector<4x128xf32>
    %16 = vector.extract_strided_slice %13 {offsets = [4, 0], sizes = [4, 128], strides = [1, 1]} : vector<16x128xf32> to vector<4x128xf32>
    %17 = vector.extract_strided_slice %13 {offsets = [8, 0], sizes = [4, 128], strides = [1, 1]} : vector<16x128xf32> to vector<4x128xf32>
    %18 = vector.extract_strided_slice %13 {offsets = [12, 0], sizes = [4, 128], strides = [1, 1]} : vector<16x128xf32> to vector<4x128xf32>
    %19 = arith.mulf %0, %13 : vector<16x128xf32>
    %20 = arith.addf %19, %14 : vector<16x128xf32>
    %21 = math.tanh %20 : vector<16x128xf32>
    %22 = vector.extract_strided_slice %21 {offsets = [0, 0], sizes = [4, 128], strides = [1, 1]} : vector<16x128xf32> to vector<4x128xf32>
    %23 = vector.extract_strided_slice %21 {offsets = [4, 0], sizes = [4, 128], strides = [1, 1]} : vector<16x128xf32> to vector<4x128xf32>
    %24 = vector.extract_strided_slice %21 {offsets = [8, 0], sizes = [4, 128], strides = [1, 1]} : vector<16x128xf32> to vector<4x128xf32>
    %25 = vector.extract_strided_slice %21 {offsets = [12, 0], sizes = [4, 128], strides = [1, 1]} : vector<16x128xf32> to vector<4x128xf32>
    %26 = arith.subf %22, %23 : vector<4x128xf32>
    %27 = arith.mulf %26, %26 : vector<4x128xf32>
    %28 = vector.shape_cast %27 : vector<4x128xf32> to vector<1x4x128xf32>
    %cst = arith.constant dense<0.000000e+00> : vector<1xf32>
    %29 = vector.multi_reduction <add>, %28, %cst [1, 2] : vector<1x4x128xf32> to vector<1xf32>
    %30 = vector.shape_cast %29 : vector<1xf32> to vector<1x1x1xf32>
    %31 = vector.extract %30[0, 0, 0] : f32 from vector<1x1x1xf32>
    %32 = math.rsqrt %31 : f32
    %33 = arith.subf %22, %24 : vector<4x128xf32>
    %34 = arith.mulf %33, %33 : vector<4x128xf32>
    %35 = vector.shape_cast %34 : vector<4x128xf32> to vector<1x4x128xf32>
    %cst_14 = arith.constant dense<0.000000e+00> : vector<1xf32>
    %36 = vector.multi_reduction <add>, %35, %cst_14 [1, 2] : vector<1x4x128xf32> to vector<1xf32>
    %37 = vector.shape_cast %36 : vector<1xf32> to vector<1x1x1xf32>
    %38 = vector.extract %37[0, 0, 0] : f32 from vector<1x1x1xf32>
    %39 = math.rsqrt %38 : f32
    %40 = arith.subf %22, %25 : vector<4x128xf32>
    %41 = arith.mulf %40, %40 : vector<4x128xf32>
    %42 = vector.shape_cast %41 : vector<4x128xf32> to vector<1x4x128xf32>
    %cst_15 = arith.constant dense<0.000000e+00> : vector<1xf32>
    %43 = vector.multi_reduction <add>, %42, %cst_15 [1, 2] : vector<1x4x128xf32> to vector<1xf32>
    %44 = vector.shape_cast %43 : vector<1xf32> to vector<1x1x1xf32>
    %45 = vector.extract %44[0, 0, 0] : f32 from vector<1x1x1xf32>
    %46 = math.rsqrt %45 : f32
    %47 = arith.subf %23, %24 : vector<4x128xf32>
    %48 = arith.mulf %47, %47 : vector<4x128xf32>
    %49 = vector.shape_cast %48 : vector<4x128xf32> to vector<1x4x128xf32>
    %cst_16 = arith.constant dense<0.000000e+00> : vector<1xf32>
    %50 = vector.multi_reduction <add>, %49, %cst_16 [1, 2] : vector<1x4x128xf32> to vector<1xf32>
    %51 = vector.shape_cast %50 : vector<1xf32> to vector<1x1x1xf32>
    %52 = vector.extract %51[0, 0, 0] : f32 from vector<1x1x1xf32>
    %53 = math.rsqrt %52 : f32
    %54 = arith.subf %24, %25 : vector<4x128xf32>
    %55 = arith.mulf %54, %54 : vector<4x128xf32>
    %56 = vector.shape_cast %55 : vector<4x128xf32> to vector<1x4x128xf32>
    %cst_17 = arith.constant dense<0.000000e+00> : vector<1xf32>
    %57 = vector.multi_reduction <add>, %56, %cst_17 [1, 2] : vector<1x4x128xf32> to vector<1xf32>
    %58 = vector.shape_cast %57 : vector<1xf32> to vector<1x1x1xf32>
    %59 = vector.extract %58[0, 0, 0] : f32 from vector<1x1x1xf32>
    %60 = math.rsqrt %59 : f32
    %c0_18 = arith.constant 0 : index
    %c0_19 = arith.constant 0 : index
    %61 = vector.load %arg1[%c0_18, %c0_19] : memref<12x128xf32, #tpu.memory_space<vmem>>, vector<2x128xf32>
    %62 = vector.broadcast %32 : f32 to vector<2x128xf32>
    %63 = arith.mulf %61, %62 : vector<2x128xf32>
    %c2_20 = arith.constant 2 : index
    %c0_21 = arith.constant 0 : index
    %64 = vector.load %arg1[%c2_20, %c0_21] : memref<12x128xf32, #tpu.memory_space<vmem>>, vector<2x128xf32>
    %65 = vector.broadcast %39 : f32 to vector<2x128xf32>
    %66 = arith.mulf %64, %65 : vector<2x128xf32>
    %c4_22 = arith.constant 4 : index
    %c0_23 = arith.constant 0 : index
    %67 = vector.load %arg1[%c4_22, %c0_23] : memref<12x128xf32, #tpu.memory_space<vmem>>, vector<2x128xf32>
    %68 = vector.broadcast %46 : f32 to vector<2x128xf32>
    %69 = arith.mulf %67, %68 : vector<2x128xf32>
    %c6_24 = arith.constant 6 : index
    %c0_25 = arith.constant 0 : index
    %70 = vector.load %arg1[%c6_24, %c0_25] : memref<12x128xf32, #tpu.memory_space<vmem>>, vector<2x128xf32>
    %71 = vector.broadcast %39 : f32 to vector<2x128xf32>
    %72 = arith.mulf %70, %71 : vector<2x128xf32>
    %c8 = arith.constant 8 : index
    %c0_26 = arith.constant 0 : index
    %73 = vector.load %arg1[%c8, %c0_26] : memref<12x128xf32, #tpu.memory_space<vmem>>, vector<2x128xf32>
    %74 = vector.broadcast %53 : f32 to vector<2x128xf32>
    %75 = arith.mulf %73, %74 : vector<2x128xf32>
    %c10 = arith.constant 10 : index
    %c0_27 = arith.constant 0 : index
    %76 = vector.load %arg1[%c10, %c0_27] : memref<12x128xf32, #tpu.memory_space<vmem>>, vector<2x128xf32>
    %77 = vector.broadcast %60 : f32 to vector<2x128xf32>
    %78 = arith.mulf %76, %77 : vector<2x128xf32>
    %79 = tpu.concatenate %63, %66, %69, %72, %75, %78 in 0 : vector<2x128xf32>, vector<2x128xf32>, vector<2x128xf32>, vector<2x128xf32>, vector<2x128xf32>, vector<2x128xf32> -> vector<12x128xf32>
    %cst_28 = arith.constant 5.000000e-01 : f32
    %80 = vector.broadcast %cst_28 : f32 to vector<12x128xf32>
    %81 = arith.mulf %80, %79 : vector<12x128xf32>
    %82 = math.tanh %81 : vector<12x128xf32>
    %cst_29 = arith.constant 5.000000e-01 : f32
    %83 = vector.broadcast %cst_29 : f32 to vector<12x128xf32>
    %84 = arith.mulf %83, %82 : vector<12x128xf32>
    %cst_30 = arith.constant 5.000000e-01 : f32
    %85 = vector.broadcast %cst_30 : f32 to vector<12x128xf32>
    %86 = arith.addf %84, %85 : vector<12x128xf32>
    %87 = vector.extract_strided_slice %86 {offsets = [0, 0], sizes = [2, 128], strides = [1, 1]} : vector<12x128xf32> to vector<2x128xf32>
    %88 = tpu.concatenate %87, %87 in 0 : vector<2x128xf32>, vector<2x128xf32> -> vector<4x128xf32>
    %89 = vector.extract_strided_slice %86 {offsets = [2, 0], sizes = [2, 128], strides = [1, 1]} : vector<12x128xf32> to vector<2x128xf32>
    %90 = tpu.concatenate %89, %89 in 0 : vector<2x128xf32>, vector<2x128xf32> -> vector<4x128xf32>
    %91 = vector.extract_strided_slice %86 {offsets = [4, 0], sizes = [2, 128], strides = [1, 1]} : vector<12x128xf32> to vector<2x128xf32>
    %92 = tpu.concatenate %91, %91 in 0 : vector<2x128xf32>, vector<2x128xf32> -> vector<4x128xf32>
    %93 = vector.extract_strided_slice %86 {offsets = [6, 0], sizes = [2, 128], strides = [1, 1]} : vector<12x128xf32> to vector<2x128xf32>
    %94 = tpu.concatenate %93, %93 in 0 : vector<2x128xf32>, vector<2x128xf32> -> vector<4x128xf32>
    %95 = vector.extract_strided_slice %86 {offsets = [8, 0], sizes = [2, 128], strides = [1, 1]} : vector<12x128xf32> to vector<2x128xf32>
    %96 = tpu.concatenate %95, %95 in 0 : vector<2x128xf32>, vector<2x128xf32> -> vector<4x128xf32>
    %97 = vector.extract_strided_slice %86 {offsets = [10, 0], sizes = [2, 128], strides = [1, 1]} : vector<12x128xf32> to vector<2x128xf32>
    %98 = tpu.concatenate %97, %97 in 0 : vector<2x128xf32>, vector<2x128xf32> -> vector<4x128xf32>
    %99 = arith.addf %1, %2 : vector<4x128xf32>
    %100 = arith.addf %1, %3 : vector<4x128xf32>
    %101 = arith.addf %1, %4 : vector<4x128xf32>
    %102 = arith.mulf %1, %2 : vector<4x128xf32>
    %103 = arith.mulf %1, %3 : vector<4x128xf32>
    %104 = arith.mulf %1, %4 : vector<4x128xf32>
    %105 = arith.maximumf %99, %100 : vector<4x128xf32>
    %106 = arith.maximumf %105, %101 : vector<4x128xf32>
    %107 = arith.maximumf %102, %103 : vector<4x128xf32>
    %108 = arith.maximumf %107, %104 : vector<4x128xf32>
    %109 = arith.subf %99, %106 : vector<4x128xf32>
    %110 = arith.subf %100, %106 : vector<4x128xf32>
    %111 = arith.subf %101, %106 : vector<4x128xf32>
    %112 = arith.subf %102, %108 : vector<4x128xf32>
    %113 = arith.subf %103, %108 : vector<4x128xf32>
    %114 = arith.subf %104, %108 : vector<4x128xf32>
    %115 = tpu.concatenate %109, %110, %111, %112, %113, %114 in 0 : vector<4x128xf32>, vector<4x128xf32>, vector<4x128xf32>, vector<4x128xf32>, vector<4x128xf32>, vector<4x128xf32> -> vector<24x128xf32>
    %116 = math.exp %115 : vector<24x128xf32>
    %117 = vector.extract_strided_slice %116 {offsets = [0, 0], sizes = [4, 128], strides = [1, 1]} : vector<24x128xf32> to vector<4x128xf32>
    %118 = vector.extract_strided_slice %116 {offsets = [4, 0], sizes = [4, 128], strides = [1, 1]} : vector<24x128xf32> to vector<4x128xf32>
    %119 = vector.extract_strided_slice %116 {offsets = [8, 0], sizes = [4, 128], strides = [1, 1]} : vector<24x128xf32> to vector<4x128xf32>
    %120 = vector.extract_strided_slice %116 {offsets = [12, 0], sizes = [4, 128], strides = [1, 1]} : vector<24x128xf32> to vector<4x128xf32>
    %121 = vector.extract_strided_slice %116 {offsets = [16, 0], sizes = [4, 128], strides = [1, 1]} : vector<24x128xf32> to vector<4x128xf32>
    %122 = vector.extract_strided_slice %116 {offsets = [20, 0], sizes = [4, 128], strides = [1, 1]} : vector<24x128xf32> to vector<4x128xf32>
    %123 = arith.addf %117, %118 : vector<4x128xf32>
    %124 = arith.addf %123, %119 : vector<4x128xf32>
    %125 = arith.addf %120, %121 : vector<4x128xf32>
    %126 = arith.addf %125, %122 : vector<4x128xf32>
    %127 = tpu.concatenate %124, %126 in 0 : vector<4x128xf32>, vector<4x128xf32> -> vector<8x128xf32>
    %cst_31 = arith.constant 1.000000e+00 : f32
    %128 = vector.broadcast %cst_31 : f32 to vector<8x128xf32>
    %129 = arith.divf %128, %127 : vector<8x128xf32>
    %130 = vector.extract_strided_slice %129 {offsets = [0, 0], sizes = [4, 128], strides = [1, 1]} : vector<8x128xf32> to vector<4x128xf32>
    %131 = vector.extract_strided_slice %129 {offsets = [4, 0], sizes = [4, 128], strides = [1, 1]} : vector<8x128xf32> to vector<4x128xf32>
    %132 = arith.mulf %117, %130 : vector<4x128xf32>
    %133 = arith.mulf %120, %131 : vector<4x128xf32>
    %134 = arith.addf %132, %133 : vector<4x128xf32>
    %135 = arith.mulf %88, %2 : vector<4x128xf32>
    %136 = arith.mulf %135, %134 : vector<4x128xf32>
    %137 = arith.addf %136, %1 : vector<4x128xf32>
    %138 = arith.mulf %15, %137 : vector<4x128xf32>
    %139 = arith.mulf %118, %130 : vector<4x128xf32>
    %140 = arith.mulf %121, %131 : vector<4x128xf32>
    %141 = arith.addf %139, %140 : vector<4x128xf32>
    %142 = arith.mulf %90, %3 : vector<4x128xf32>
    %143 = arith.mulf %142, %141 : vector<4x128xf32>
    %144 = arith.addf %143, %1 : vector<4x128xf32>
    %145 = arith.mulf %15, %144 : vector<4x128xf32>
    %146 = arith.mulf %119, %130 : vector<4x128xf32>
    %147 = arith.mulf %122, %131 : vector<4x128xf32>
    %148 = arith.addf %146, %147 : vector<4x128xf32>
    %149 = arith.mulf %92, %4 : vector<4x128xf32>
    %150 = arith.mulf %149, %148 : vector<4x128xf32>
    %151 = arith.addf %150, %1 : vector<4x128xf32>
    %152 = arith.mulf %15, %151 : vector<4x128xf32>
    %153 = arith.addf %3, %1 : vector<4x128xf32>
    %154 = arith.addf %3, %2 : vector<4x128xf32>
    %155 = arith.addf %3, %4 : vector<4x128xf32>
    %156 = arith.mulf %3, %1 : vector<4x128xf32>
    %157 = arith.mulf %3, %2 : vector<4x128xf32>
    %158 = arith.mulf %3, %4 : vector<4x128xf32>
    %159 = arith.maximumf %153, %154 : vector<4x128xf32>
    %160 = arith.maximumf %159, %155 : vector<4x128xf32>
    %161 = arith.maximumf %156, %157 : vector<4x128xf32>
    %162 = arith.maximumf %161, %158 : vector<4x128xf32>
    %163 = arith.subf %153, %160 : vector<4x128xf32>
    %164 = arith.subf %154, %160 : vector<4x128xf32>
    %165 = arith.subf %155, %160 : vector<4x128xf32>
    %166 = arith.subf %156, %162 : vector<4x128xf32>
    %167 = arith.subf %157, %162 : vector<4x128xf32>
    %168 = arith.subf %158, %162 : vector<4x128xf32>
    %169 = tpu.concatenate %163, %164, %165, %166, %167, %168 in 0 : vector<4x128xf32>, vector<4x128xf32>, vector<4x128xf32>, vector<4x128xf32>, vector<4x128xf32>, vector<4x128xf32> -> vector<24x128xf32>
    %170 = math.exp %169 : vector<24x128xf32>
    %171 = vector.extract_strided_slice %170 {offsets = [0, 0], sizes = [4, 128], strides = [1, 1]} : vector<24x128xf32> to vector<4x128xf32>
    %172 = vector.extract_strided_slice %170 {offsets = [4, 0], sizes = [4, 128], strides = [1, 1]} : vector<24x128xf32> to vector<4x128xf32>
    %173 = vector.extract_strided_slice %170 {offsets = [8, 0], sizes = [4, 128], strides = [1, 1]} : vector<24x128xf32> to vector<4x128xf32>
    %174 = vector.extract_strided_slice %170 {offsets = [12, 0], sizes = [4, 128], strides = [1, 1]} : vector<24x128xf32> to vector<4x128xf32>
    %175 = vector.extract_strided_slice %170 {offsets = [16, 0], sizes = [4, 128], strides = [1, 1]} : vector<24x128xf32> to vector<4x128xf32>
    %176 = vector.extract_strided_slice %170 {offsets = [20, 0], sizes = [4, 128], strides = [1, 1]} : vector<24x128xf32> to vector<4x128xf32>
    %177 = arith.addf %171, %172 : vector<4x128xf32>
    %178 = arith.addf %177, %173 : vector<4x128xf32>
    %179 = arith.addf %174, %175 : vector<4x128xf32>
    %180 = arith.addf %179, %176 : vector<4x128xf32>
    %181 = tpu.concatenate %178, %180 in 0 : vector<4x128xf32>, vector<4x128xf32> -> vector<8x128xf32>
    %cst_32 = arith.constant 1.000000e+00 : f32
    %182 = vector.broadcast %cst_32 : f32 to vector<8x128xf32>
    %183 = arith.divf %182, %181 : vector<8x128xf32>
    %184 = vector.extract_strided_slice %183 {offsets = [0, 0], sizes = [4, 128], strides = [1, 1]} : vector<8x128xf32> to vector<4x128xf32>
    %185 = vector.extract_strided_slice %183 {offsets = [4, 0], sizes = [4, 128], strides = [1, 1]} : vector<8x128xf32> to vector<4x128xf32>
    %186 = arith.mulf %171, %184 : vector<4x128xf32>
    %187 = arith.mulf %174, %185 : vector<4x128xf32>
    %188 = arith.addf %186, %187 : vector<4x128xf32>
    %189 = arith.mulf %94, %1 : vector<4x128xf32>
    %190 = arith.mulf %189, %188 : vector<4x128xf32>
    %191 = arith.addf %190, %3 : vector<4x128xf32>
    %192 = arith.mulf %17, %191 : vector<4x128xf32>
    %193 = arith.addf %136, %190 : vector<4x128xf32>
    %194 = arith.addf %138, %192 : vector<4x128xf32>
    %195 = arith.mulf %172, %184 : vector<4x128xf32>
    %196 = arith.mulf %175, %185 : vector<4x128xf32>
    %197 = arith.addf %195, %196 : vector<4x128xf32>
    %198 = arith.mulf %96, %2 : vector<4x128xf32>
    %199 = arith.mulf %198, %197 : vector<4x128xf32>
    %200 = arith.addf %199, %3 : vector<4x128xf32>
    %201 = arith.mulf %17, %200 : vector<4x128xf32>
    %202 = arith.addf %143, %199 : vector<4x128xf32>
    %203 = arith.addf %145, %201 : vector<4x128xf32>
    %204 = arith.mulf %173, %184 : vector<4x128xf32>
    %205 = arith.mulf %176, %185 : vector<4x128xf32>
    %206 = arith.addf %204, %205 : vector<4x128xf32>
    %207 = arith.mulf %98, %4 : vector<4x128xf32>
    %208 = arith.mulf %207, %206 : vector<4x128xf32>
    %209 = arith.addf %208, %3 : vector<4x128xf32>
    %210 = arith.mulf %17, %209 : vector<4x128xf32>
    %211 = arith.addf %150, %208 : vector<4x128xf32>
    %212 = arith.addf %152, %210 : vector<4x128xf32>
    %213 = arith.mulf %16, %193 : vector<4x128xf32>
    %214 = arith.addf %194, %213 : vector<4x128xf32>
    %215 = arith.mulf %16, %202 : vector<4x128xf32>
    %216 = arith.addf %203, %215 : vector<4x128xf32>
    %217 = arith.mulf %16, %211 : vector<4x128xf32>
    %218 = arith.addf %212, %217 : vector<4x128xf32>
    %219 = arith.mulf %18, %193 : vector<4x128xf32>
    %220 = arith.addf %214, %219 : vector<4x128xf32>
    %221 = arith.mulf %18, %202 : vector<4x128xf32>
    %222 = arith.addf %216, %221 : vector<4x128xf32>
    %223 = arith.mulf %18, %211 : vector<4x128xf32>
    %224 = arith.addf %218, %223 : vector<4x128xf32>
    %225 = arith.addf %220, %222 : vector<4x128xf32>
    %226 = arith.addf %225, %224 : vector<4x128xf32>
    %cst_33 = arith.constant 0.333333343 : f32
    %227 = vector.broadcast %cst_33 : f32 to vector<4x128xf32>
    %228 = arith.mulf %226, %227 : vector<4x128xf32>
    %229 = math.tanh %228 : vector<4x128xf32>
    %c0_34 = arith.constant 0 : index
    %c0_35 = arith.constant 0 : index
    %230 = vector.load %arg4[%c0_34, %c0_35] : memref<4x128xf32, #tpu.memory_space<vmem>>, vector<4x128xf32>
    tpu.vector_store %arg4[%c0_34, %c0_35], %229 {strides = array<i32>} : memref<4x128xf32, #tpu.memory_space<vmem>>, vector<4x128xf32>,
    return
  }
}

</mosaic_0001>

<bundles_post_ra>
// kernel: tpu_custom_call.1
= control target key start
LH: loop header
LB: loop body
LE: loop exit
PB: predicated region body
PF: predicated region fallthrough
CT: control target
= control target key end

     0   :  { %9 = vsyncpa [#allocation3], 0  ;;  %s864_s0 = inlined_call_operand.hbm [shape: f32[16,128], index: 0, kind: input, shape index: {}]   ;;  %s865_s1 = inlined_call_operand.hbm [shape: f32[12,128], index: 1, kind: input, shape index: {}]   ;;  %s866_s2 = inlined_call_operand.hbm [shape: f32[8,128], index: 2, kind: input, shape index: {}]   ;;  %s867_s3 = inlined_call_operand.vmem [shape: f32[8,128], index: 3, kind: input, shape index: {}]   ;;  %s868_s4 = inlined_call_operand.hbm [shape: f32[4,128], index: 4, kind: output, shape index: {}]  }
   0x1   :  { %10 = vsyncpa [#allocation6], 0 }
   0x2   :  { %11 = vsyncpa [#allocation4], 0  ;;  %s651_s15 = smov [#allocation5]   ;;  %s652_s17 = smov [#allocation2]  }
   0x3   :  { %s29_s16 = sshll.u32 %s651_s15, 4  ;;  %s17_s18 = sshll.u32 %s652_s17, 4  ;;  %s30_s16 = int_to_ptr.vmem [resolvable:$true] %s29_s16  ;;  %s682_s18 = int_to_ptr.vmem [resolvable:$true] %s17_s18 }
   0x4   :  { %s557_s21 = scalar_lea.hbm %s865_s1, 256 }
   0x5   :  { %p558_p0 = scmp.ne.s32.totalorder %s865_s1, %s557_s21  ;;  %p561_p1 = scmp.lt.u32.totalorder %s557_s21, %s865_s1 }
   0x7   :  { %p563_p2 = pnand %p561_p1, %p558_p0 }
   0x9   :  { %566 = shalt.err (!%p563_p2)
}
   0xa   :  { %s567_s26 = scalar_lea.vmem %s30_s16, 256  ;;  %p572_p4 = scmp.lt.s32.totalorder %s30_s16, %s30_s16 }
   0xb   :  { %p568_p3 = scmp.ne.s32.totalorder %s30_s16, %s567_s26  ;;  %p573_p5 = scmp.lt.s32.totalorder %s567_s26, %s567_s26 }
   0xd   :  { %p574_p6 = por %p573_p5, %p572_p4 }
   0xf   :  { %p575_p7 = pnand %p574_p6, %p568_p3 }
  0x11   :  { %578 = shalt.err (!%p575_p7)
}
  0x12   :  { %s653_s27 = smov 128   ;;  %s654_s28 = smov 8  }
  0x13   :  { %35 = dma.hbm_to_vmem [thread:$0]  %s865_s1, 256, %s30_s16, [#allocation6], %s653_s27, %s653_s27, %s654_s28  }
  0x14   :  { %s579_s7 = scalar_lea.hbm %s864_s0, 256 }
  0x15   :  { %p580_p8 = scmp.ne.s32.totalorder %s864_s0, %s579_s7  ;;  %p583_p9 = scmp.lt.u32.totalorder %s579_s7, %s864_s0 }
  0x17   :  { %p585_p10 = pnand %p583_p9, %p580_p8 }
  0x19   :  { %588 = shalt.err (!%p585_p10)
}
  0x1a   :  { %s589_s12 = scalar_lea.vmem %s682_s18, 256  ;;  %p594_p12 = scmp.lt.s32.totalorder %s682_s18, %s682_s18 }
  0x1b   :  { %p590_p11 = scmp.ne.s32.totalorder %s682_s18, %s589_s12  ;;  %p595_p13 = scmp.lt.s32.totalorder %s589_s12, %s589_s12 }
  0x1d   :  { %p596_p0 = por %p595_p13, %p594_p12 }
  0x1f   :  { %p597_p1 = pnand %p596_p0, %p590_p11 }
  0x21   :  { %600 = shalt.err (!%p597_p1)
}
  0x22   :  { %23 = dma.hbm_to_vmem [thread:$0]  %s864_s0, 256, %s682_s18, [#allocation3], %s653_s27, %s653_s27, %s654_s28  }
  0x23   :  { %s655_s14 = smov [#allocation7]   ;;  %s601_s19 = scalar_lea.hbm %s866_s2, 128 }
  0x24   :  { %s42_s15 = sshll.u32 %s655_s14, 4  ;;  %p602_p2 = scmp.ne.s32.totalorder %s866_s2, %s601_s19  ;;  %s43_s15 = int_to_ptr.vmem [resolvable:$true] %s42_s15 }
  0x25   :  { %p605_p3 = scmp.lt.u32.totalorder %s601_s19, %s866_s2 }
  0x27   :  { %p607_p4 = pnand %p605_p3, %p602_p2 }
  0x29   :  { %610 = shalt.err (!%p607_p4)
}
  0x2a   :  { %s611_s24 = scalar_lea.vmem %s43_s15, 128  ;;  %p616_p6 = scmp.lt.s32.totalorder %s43_s15, %s43_s15 }
  0x2b   :  { %p612_p5 = scmp.ne.s32.totalorder %s43_s15, %s611_s24  ;;  %p617_p7 = scmp.lt.s32.totalorder %s611_s24, %s611_s24 }
  0x2d   :  { %p618_p8 = por %p617_p7, %p616_p6 }
  0x2f   :  { %p619_p9 = pnand %p618_p8, %p612_p5 }
  0x31   :  { %622 = shalt.err (!%p619_p9)
}
  0x32   :  { %45 = dma.hbm_to_vmem [thread:$0]  %s866_s2, 128, %s43_s15, [#allocation6]  }
  0x33   :  { %645 = dma.done.wait [#allocation3], 256  }
  0x34   :  { %646 = vsyncadd [#allocation3], 4294967040 }
  0x35   :  { %647 = dma.done.wait [#allocation6], 384  }
  0x36   :  { %648 = vsyncadd [#allocation6], 4294966912  ;;  %vm83_vm0 = vcmask 1041408   ;;  %v59_v0 = vld [vmem:[#allocation7] sm:$0x3]  ;;  %vm85_vm1 = vcmask 1043456  }
  0x37   :  { %v60_v1 = vld [vmem:[#allocation7 + $0x2] sm:$0x3]  ;;  %vm87_vm2 = vcmask 1045504   ;;  %v63_v2 = vld [vmem:[%s867_s3] sm:$0x3]  ;;  %v68_v4 = vrot.slane %v59_v0, 6 }
  0x38   :  { %v64_v3 = vld [vmem:[%s867_s3 + $0x2] sm:$0x3]  ;;  %v71_v5 = vrot.slane %v60_v1, 4  ;;  %v73_v7 = vrot.slane %v60_v1, 2  ;;  %v93_v8 = vrot.slane %v63_v2, 6  ;;  %v749_v26 = vld [vmem:[#allocation2 + $0x8] sm:$0xff] }
  0x39   :  { %v731_v6 = vld [vmem:[#allocation2] sm:$0xff]  ;;  %v96_v9 = vrot.slane %v64_v3, 4  ;;  %v98_v10 = vrot.slane %v64_v3, 2  ;;  %v84_v11 = vsel %vm83_vm0, %v59_v0, %v68_v4  ;;  %s656_s14 = smov [#allocation8]  }
  0x3a   :  { %v61_v12 = vld [vmem:[#allocation7 + $0x4] sm:$0x3]  ;;  %v62_v13 = vld [vmem:[#allocation7 + $0x6] sm:$0x3]  ;;  %v86_v15 = vsel %vm85_vm1, %v84_v11, %v71_v5  ;;  %v108_v16 = vsel %vm83_vm0, %v63_v2, %v93_v8  ;;  %s485_s15 = sshll.u32 %s656_s14, 4  ;;  %s486_s15 = int_to_ptr.vmem [resolvable:$true] %s485_s15 }
  0x3b   :  { %v65_v14 = vld [vmem:[%s867_s3 + $0x4] sm:$0x3]  ;;  %v66_v17 = vld [vmem:[%s867_s3 + $0x6] sm:$0x3]  ;;  %v76_v18 = vrot.slane %v61_v12, 6  ;;  %v79_v19 = vrot.slane %v62_v13, 4  ;;  %v743_v20 = vsel %vm87_vm2, %v86_v15, %v73_v7  ;;  %v109_v21 = vsel %vm85_vm1, %v108_v16, %v96_v9  ;;  %p628_p11 = scmp.lt.s32.totalorder %s486_s15, %s486_s15 }
  0x3c   :  { %v81_v22 = vrot.slane %v62_v13, 2  ;;  %v101_v23 = vrot.slane %v65_v14, 6  ;;  %v110_v24 = vsel %vm87_vm2, %v109_v21, %v98_v10  ;;  %v114_v25 = vmul.f32 %v743_v20, %v731_v6  ;;  %s623_s16 = scalar_lea.vmem %s486_s15, 64 }
  0x3d   :  { %v89_v27 = vsel %vm83_vm0, %v61_v12, %v76_v18  ;;  %v104_v28 = vrot.slane %v66_v17, 4  ;;  %v106_v30 = vrot.slane %v66_v17, 2  ;;  %p624_p10 = scmp.ne.s32.totalorder %s486_s15, %s623_s16  ;;  %p629_p12 = scmp.lt.s32.totalorder %s623_s16, %s623_s16 }
  0x3e   :  { %v90_v29 = vsel %vm85_vm1, %v89_v27, %v79_v19  ;;  %v111_v31 = vsel %vm83_vm0, %v65_v14, %v101_v23  ;;  %v116_v32 = vadd.f32 %v114_v25, %v110_v24  ;;  %v202_v23 = vld [vmem:[#allocation5] sm:$0x3] }
  0x3f   :  { %v755_v33 = vsel %vm87_vm2, %v90_v29, %v81_v22  ;;  %v112_v34 = vsel %vm85_vm1, %v111_v31, %v104_v28  ;;  %v205_v22 = vld [vmem:[#allocation5 + $0x2] sm:$0x3]  ;;  %p630_p13 = por %p629_p12, %p628_p11 }
  0x40   :  { %v113_v35 = vsel %vm87_vm2, %v112_v34, %v106_v30  ;;  %v115_v36 = vmul.f32 %v755_v33, %v749_v26  ;;  %521 = vtanh.f32 %v116_v32 }
  0x41   :  { %p631_p0 = pnand %p630_p13, %p624_p10 }
  0x42   :  { %v117_v37 = vadd.f32 %v115_v36, %v113_v35 }
  0x44   :  { %523 = vtanh.f32 %v117_v37 }
  0x4a   :  { %v522_v38 = vpop.eup %521 }
  0x4b   :  { %v121_v39 = vrot.slane %v522_v38, 4 }
  0x4d   :  { %v123_v41 = vsub.f32 %v522_v38, %v121_v39 }
  0x4e   :  { %v524_v40 = vpop.eup %523 }
  0x4f   :  { %v138_v42 = vsub.f32 %v522_v38, %v524_v40  ;;  %v154_v43 = vrot.slane %v524_v40, 4  ;;  %v124_v44 = vmul.f32 %v123_v41, %v123_v41  ;;  %v211_v41 = vld [vmem:[#allocation5 + $0x6] sm:$0x3] }
  0x51   :  { %v139_v45 = vmul.f32 %v138_v42, %v138_v42  ;;  %v156_v46 = vsub.f32 %v522_v38, %v154_v43  ;;  %v125_v47 = vsel %vm85_vm1, %v124_v44, 0.0  ;;  %v187_v53 = vsub.f32 %v524_v40, %v154_v43  ;;  %v208_v42 = vld [vmem:[#allocation5 + $0x4] sm:$0x3] }
  0x52   :  { %126 = vadd.xlane.f32.xlu0 %v125_v47 }
  0x53   :  { %v157_v48 = vmul.f32 %v156_v46, %v156_v46  ;;  %v140_v49 = vsel %vm85_vm1, %v139_v45, 0.0  ;;  %v188_v54 = vmul.f32 %v187_v53, %v187_v53 }
  0x55   :  { %v158_v50 = vsel %vm85_vm1, %v157_v48, 0.0  ;;  %v172_v51 = vrot.slane %v157_v48, 4  ;;  %v189_v55 = vsel %vm85_vm1, %v188_v54, 0.0 }
  0x56   :  { %159 = vadd.xlane.f32.xlu1 %v158_v50  ;;  %141 = vadd.xlane.f32.xlu0 %v140_v49 }
  0x57   :  { %v174_v52 = vsel %vm85_vm1, %v172_v51, 0.0 }
  0x5a   :  { %175 = vadd.xlane.f32.xlu1 %v174_v52  ;;  %190 = vadd.xlane.f32.xlu0 %v189_v55 }
  0xdf   :  { %v127_v56 = vpop.xlane.xlu0 %126 }
  0xe0   :  { %v128_v57 = vrot.slane %v127_v56, 4 }
  0xe2   :  { %v129_v58 = vadd.f32 %v128_v57, %v127_v56  ;;  %v772_v56 = vrot.slane %v731_v6, 4 }
  0xe3   :  { %v142_v63 = vpop.xlane.xlu0 %141  ;;  %v160_v9 = vpop.xlane.xlu1 %159 }
  0xe4   :  { %v130_v59 = vrot.slane %v129_v58, 2  ;;  %v143_v0 = vrot.slane %v142_v63, 4  ;;  %v161_v10 = vrot.slane %v160_v9, 4  ;;  %v264_v57 = vadd.f32 %v772_v56, %v731_v6 }
  0xe6   :  { %v131_v60 = vadd.f32 %v130_v59, %v129_v58  ;;  %v144_v1 = vadd.f32 %v143_v0, %v142_v63  ;;  %v162_v11 = vadd.f32 %v161_v10, %v160_v9  ;;  %v265_v58 = vadd.f32 %v749_v26, %v731_v6 }
  0xe7   :  { %v176_v18 = vpop.xlane.xlu1 %175  ;;  %v191_v38 = vpop.xlane.xlu0 %190  ;;  %v779_v59 = vrot.slane %v749_v26, 4  ;;  %v351_v63 = vmul.f32 %v772_v56, %v749_v26 }
  0xe8   :  { %v132_v61 = vrot.slane %v131_v60, 1  ;;  %v145_v2 = vrot.slane %v144_v1, 2  ;;  %v163_v12 = vrot.slane %v162_v11, 2  ;;  %v177_v19 = vrot.slane %v176_v18, 4 }
  0xe9   :  { %v192_v39 = vrot.slane %v191_v38, 4  ;;  %v269_v0 = vadd.f32 %v779_v59, %v731_v6 }
  0xea   :  { %v133_v62 = vadd.f32 %v132_v61, %v131_v60  ;;  %v146_v4 = vadd.f32 %v145_v2, %v144_v1  ;;  %v164_v14 = vadd.f32 %v163_v12, %v162_v11  ;;  %v178_v21 = vadd.f32 %v177_v19, %v176_v18 }
  0xeb   :  { %v193_v40 = vadd.f32 %v192_v39, %v191_v38  ;;  %v270_v60 = vmul.f32 %v772_v56, %v731_v6  ;;  %v271_v61 = vmul.f32 %v749_v26, %v731_v6  ;;  %v273_v1 = vmax.f32 %v264_v57, %v265_v58 }
  0xec   :  { %495 = vpush %v133_v62  ;;  %v147_v5 = vrot.slane %v146_v4, 1  ;;  %v165_v15 = vrot.slane %v164_v14, 1  ;;  %v179_v25 = vrot.slane %v178_v21, 2  ;;  %v349_v62 = vadd.f32 %v772_v56, %v749_v26 }
  0xed   :  { %v194_v44 = vrot.slane %v193_v40, 2  ;;  %v272_v2 = vmul.f32 %v779_v59, %v731_v6  ;;  %v355_v9 = vmax.f32 %v271_v61, %v351_v63  ;;  %v274_v10 = vmax.f32 %v273_v1, %v269_v0 }
  0xee   :  { %v148_v8 = vadd.f32 %v147_v5, %v146_v4  ;;  %v166_v17 = vadd.f32 %v165_v15, %v164_v14  ;;  %v180_v32 = vadd.f32 %v179_v25, %v178_v21  ;;  %v350_v5 = vadd.f32 %v779_v59, %v749_v26 }
  0xef   :  { %v195_v50 = vadd.f32 %v194_v44, %v193_v40  ;;  %v278_v14 = vsub.f32 %v265_v58, %v274_v10  ;;  %v277_v18 = vsub.f32 %v264_v57, %v274_v10 }
  0xf0   :  { %v181_v35 = vrot.slane %v180_v32, 1 }
  0xf1   :  { %v196_v53 = vrot.slane %v195_v50, 1  ;;  %v284_v19 = vrot.slane %v278_v14, 4  ;;  %v213_v14 = vld [vmem:[#allocation5 + $0x8] sm:$0x3] }
  0xf2   :  { %v182_v37 = vadd.f32 %v181_v35, %v180_v32  ;;  %v279_v35 = vsub.f32 %v269_v0, %v274_v10 }
  0xf3   :  { %v197_v55 = vadd.f32 %v196_v53, %v195_v50 }
 0x11d   :  { %s496_s3 = spop %495 }
 0x11e   :  { %v135_v3 = vstv %s496_s3 }
 0x11f   :  { %525 = vrsqrt.f32 %v135_v3  ;;  %v275_v3 = vmax.f32 %v270_v60, %v271_v61 }
 0x121   :  { %v276_v11 = vmax.f32 %v275_v3, %v272_v2 }
 0x123   :  { %v282_v15 = vsub.f32 %v272_v2, %v276_v11 }
 0x129   :  { %v526_v7 = vpop.eup %525 }
 0x12a   :  { %497 = vpush %v526_v7  ;;  %v353_v7 = vmax.f32 %v265_v58, %v349_v62 }
 0x12b   :  { %499 = vpush %v148_v8  ;;  %v352_v8 = vmul.f32 %v779_v59, %v749_v26 }
 0x12c   :  { %v354_v12 = vmax.f32 %v353_v7, %v350_v5 }
 0x12e   :  { %v359_v38 = vsub.f32 %v350_v5, %v354_v12 }
 0x15b   :  { %s498_s6 = spop %497 }
 0x15c   :  { %s500_s7 = spop %499  ;;  %v203_v24 = vstv %s498_s6 }
 0x15d   :  { %v150_v13 = vstv %s500_s7  ;;  %v204_v30 = vmul.f32 %v203_v24, %v202_v23  ;;  %v290_v23 = vrot.slane %v282_v15, 4  ;;  %v357_v24 = vsub.f32 %v265_v58, %v354_v12 }
 0x15e   :  { %527 = vrsqrt.f32 %v150_v13  ;;  %v356_v13 = vmax.f32 %v355_v9, %v352_v8 }
 0x168   :  { %v528_v16 = vpop.eup %527 }
 0x169   :  { %501 = vpush %v528_v16  ;;  %v358_v16 = vsub.f32 %v349_v62, %v354_v12 }
 0x16a   :  { %503 = vpush %v166_v17  ;;  %v362_v17 = vsub.f32 %v352_v8, %v356_v13 }
 0x16b   :  { %v364_v25 = vrot.slane %v358_v16, 4 }
 0x19a   :  { %s502_s8 = spop %501 }
 0x19b   :  { %v206_v27 = vstv %s502_s8  ;;  %s504_s9 = spop %503 }
 0x19c   :  { %v207_v28 = vmul.f32 %v206_v27, %v205_v22  ;;  %v168_v29 = vstv %s504_s9  ;;  %v212_v43 = vmul.f32 %v211_v41, %v206_v27  ;;  %v281_v22 = vsub.f32 %v271_v61, %v276_v11 }
 0x19d   :  { %529 = vrsqrt.f32 %v168_v29  ;;  %v280_v27 = vsub.f32 %v270_v60, %v276_v11  ;;  %v361_v29 = vsub.f32 %v351_v63, %v356_v13  ;;  %v216_v11 = vld [vmem:[#allocation5 + $0xa] sm:$0x3] }
 0x19e   :  { %v220_v31 = vrot.slane %v207_v28, 6  ;;  %v226_v49 = vrot.slane %v212_v43, 2  ;;  %v360_v28 = vsub.f32 %v271_v61, %v356_v13  ;;  %v294_v32 = vsel %vm85_vm1, %v281_v22, %v290_v23 }
 0x19f   :  { %v299_v41 = vmul.f32 1.442695, %v294_v32 }
 0x1a0   :  { %v231_v34 = vsel %vm83_vm0, %v204_v30, %v220_v31  ;;  %v370_v30 = vrot.slane %v362_v17, 4  ;;  %v292_v31 = vsel %vm85_vm1, %v277_v18, %v284_v19  ;;  %v367_v39 = vrot.slane %v360_v28, 4 }
 0x1a2   :  { %v374_v40 = vsel %vm85_vm1, %v361_v29, %v370_v30 }
 0x1a3   :  { %v379_v43 = vmul.f32 1.442695, %v374_v40 }
 0x1a7   :  { %v530_v36 = vpop.eup %529 }
 0x1a8   :  { %505 = vpush %v530_v36  ;;  %v287_v36 = vrot.slane %v280_v27, 4 }
 0x1a9   :  { %507 = vpush %v182_v37  ;;  %v295_v37 = vmul.f32 1.442695, %v292_v31 }
 0x1aa   :  { %v293_v44 = vsel %vm85_vm1, %v279_v35, %v287_v36 }
 0x1d9   :  { %s506_s10 = spop %505 }
 0x1da   :  { %v209_v45 = vstv %s506_s10  ;;  %s508_s11 = spop %507 }
 0x1db   :  { %v210_v46 = vmul.f32 %v209_v45, %v208_v42  ;;  %v184_v47 = vstv %s508_s11  ;;  %v373_v45 = vsel %vm85_vm1, %v359_v38, %v367_v39 }
 0x1dc   :  { %531 = vrsqrt.f32 %v184_v47  ;;  %v377_v47 = vmul.f32 1.442695, %v373_v45 }
 0x1dd   :  { %v223_v48 = vrot.slane %v210_v46, 4  ;;  %v297_v46 = vmul.f32 1.442695, %v293_v44 }
 0x1df   :  { %v232_v51 = vsel %vm85_vm1, %v231_v34, %v223_v48  ;;  %v372_v34 = vsel %vm85_vm1, %v357_v24, %v364_v25 }
 0x1e0   :  { %v769_v52 = vsel %vm87_vm2, %v232_v51, %v226_v49  ;;  %v375_v42 = vmul.f32 1.442695, %v372_v34 }
 0x1e1   :  { %v235_v63 = vmul.f32 0.5, %v769_v52 }
 0x1e6   :  { %v532_v54 = vpop.eup %531 }
 0x1e7   :  { %509 = vpush %v532_v54 }
 0x1e8   :  { %511 = vpush %v197_v55 }
 0x218   :  { %s789_s12 = spop %509 }
 0x219   :  { %s512_s1 = spop %511  ;;  %v214_v15 = vstv %s789_s12 }
 0x21a   :  { %v199_v4 = vstv %s512_s1 }
 0x21b   :  { %533 = vrsqrt.f32 %v199_v4 }
 0x21c   :  { %535 = vpow2.f32 %v295_v37 }
 0x21d   :  { %537 = vpow2.f32 %v299_v41 }
 0x21e   :  { %539 = vpow2.f32 %v375_v42 }
 0x21f   :  { %541 = vpow2.f32 %v379_v43 }
 0x220   :  { %543 = vpow2.f32 %v297_v46 }
 0x221   :  { %545 = vpow2.f32 %v377_v47 }
 0x222   :  { %547 = vtanh.f32 %v235_v63 }
 0x225   :  { %v534_v21 = vpop.eup %533 }
 0x226   :  { %513 = vpush %v534_v21  ;;  %v536_v48 = vpop.eup %535  ;;  %v215_v21 = vmul.f32 %v214_v15, %v213_v14 }
 0x227   :  { %v538_v49 = vpop.eup %537  ;;  %v302_v53 = vrot.slane %v536_v48, 4 }
 0x228   :  { %v805_v50 = vpop.eup %539  ;;  %v307_v54 = vrot.slane %v538_v49, 4 }
 0x229   :  { %v807_v51 = vpop.eup %541  ;;  %v382_v57 = vrot.slane %v805_v50, 4  ;;  %v304_v61 = vadd.f32 %v536_v48, %v302_v53 }
 0x22a   :  { %v544_v55 = vpop.eup %543  ;;  %v387_v58 = vrot.slane %v807_v51, 4 }
 0x22b   :  { %v546_v60 = vpop.eup %545  ;;  %v309_v62 = vadd.f32 %v544_v55, %v307_v54  ;;  %v384_v0 = vadd.f32 %v805_v50, %v382_v57  ;;  %v305_v2 = vadd.f32 %v544_v55, %v304_v61 }
 0x22c   :  { %v389_v1 = vadd.f32 %v546_v60, %v387_v58  ;;  %v548_v9 = vpop.eup %547 }
 0x22d   :  { %v310_v3 = vadd.f32 %v538_v49, %v309_v62  ;;  %v385_v4 = vadd.f32 %v546_v60, %v384_v0  ;;  %v239_v10 = vmul.f32 0.5, %v548_v9 }
 0x22e   :  { %v390_v5 = vadd.f32 %v807_v51, %v389_v1 }
 0x22f   :  { %v311_v7 = vsel %vm85_vm1, %v305_v2, %v310_v3  ;;  %v241_v13 = vadd.f32 0.5, %v239_v10 }
 0x230   :  { %v391_v8 = vsel %vm85_vm1, %v385_v4, %v390_v5  ;;  %549 = vrcp.f32 %v311_v7 }
 0x231   :  { %551 = vrcp.f32 %v391_v8  ;;  %v244_v24 = vrot.slane %v241_v13, 6  ;;  %v250_v25 = vrot.slane %v241_v13, 4  ;;  %v247_v42 = vrot.slane %v241_v13, 2 }
 0x233   :  { %v246_v35 = vsel %vm83_vm0, %v241_v13, %v244_v24  ;;  %v253_v37 = vsel %vm83_vm0, %v244_v24, %v250_v25  ;;  %v249_v53 = vsel %vm83_vm0, %v247_v42, %v241_v13 }
 0x234   :  { %v320_v43 = vmul.f32 %v772_v56, %v246_v35  ;;  %v400_v45 = vmul.f32 %v253_v37, %v731_v6  ;;  %v333_v62 = vmul.f32 %v249_v53, %v749_v26 }
 0x23a   :  { %v550_v52 = vpop.eup %549 }
 0x23b   :  { %v552_v12 = vpop.eup %551  ;;  %v315_v18 = vmul.f32 %v550_v52, %v544_v55  ;;  %v325_v19 = vrot.slane %v550_v52, 4  ;;  %v314_v29 = vmul.f32 %v550_v52, %v536_v48  ;;  %v340_v41 = vmul.f32 %v550_v52, %v538_v49 }
 0x23c   :  { %v395_v23 = vmul.f32 %v552_v12, %v546_v60  ;;  %v394_v34 = vmul.f32 %v552_v12, %v805_v50  ;;  %v407_v36 = vrot.slane %v552_v12, 4 }
 0x23d   :  { %v317_v30 = vrot.slane %v315_v18, 4  ;;  %v328_v31 = vmul.f32 %v538_v49, %v325_v19  ;;  %v327_v39 = vmul.f32 %v536_v48, %v325_v19  ;;  %v342_v55 = vrot.slane %v340_v41, 4 }
 0x23e   :  { %v397_v32 = vrot.slane %v395_v23, 4  ;;  %v410_v46 = vmul.f32 %v807_v51, %v407_v36  ;;  %v409_v58 = vmul.f32 %v805_v50, %v407_v36  ;;  %v424_v48 = vmul.f32 %v552_v12, %v807_v51 }
 0x23f   :  { %v319_v38 = vadd.f32 %v317_v30, %v314_v29  ;;  %v330_v40 = vrot.slane %v328_v31, 4  ;;  %v252_v49 = vsel %vm83_vm0, %v250_v25, %v247_v42  ;;  %v344_v1 = vadd.f32 %v342_v55, %v315_v18 }
 0x240   :  { %v399_v44 = vadd.f32 %v397_v32, %v394_v34  ;;  %v412_v60 = vrot.slane %v410_v46, 4  ;;  %v345_v2 = vmul.f32 %v779_v59, %v252_v49  ;;  %v426_v5 = vrot.slane %v424_v48, 4 }
 0x241   :  { %v332_v47 = vadd.f32 %v330_v40, %v327_v39  ;;  %v321_v54 = vmul.f32 %v320_v43, %v319_v38 }
 0x242   :  { %v401_v57 = vmul.f32 %v400_v45, %v399_v44  ;;  %v414_v4 = vadd.f32 %v412_v60, %v409_v58  ;;  %v346_v10 = vmul.f32 %v345_v2, %v344_v1  ;;  %v428_v52 = vadd.f32 %v426_v5, %v395_v23 }
 0x243   :  { %v335_v63 = vrot.slane %v332_v47, 4  ;;  %v322_v14 = vadd.f32 %v321_v54, %v731_v6 }
 0x244   :  { %v404_v3 = vadd.f32 %v401_v57, %v321_v54  ;;  %v417_v51 = vrot.slane %v414_v4, 4  ;;  %v402_v15 = vadd.f32 %v401_v57, %v749_v26  ;;  %v347_v19 = vadd.f32 %v346_v10, %v731_v6 }
 0x245   :  { %v337_v8 = vmul.f32 %v335_v63, %v333_v62  ;;  %v323_v24 = vmul.f32 %v322_v14, %v743_v20 }
 0x246   :  { %v403_v25 = vmul.f32 %v402_v15, %v755_v33  ;;  %v348_v30 = vmul.f32 %v347_v19, %v743_v20 }
 0x247   :  { %v338_v18 = vadd.f32 %v337_v8, %v731_v6 }
 0x248   :  { %v405_v36 = vadd.f32 %v403_v25, %v323_v24 }
 0x257   :  { %s514_s13 = spop %513 }
 0x258   :  { %v217_v16 = vstv %s514_s13 }
 0x259   :  { %v218_v17 = vmul.f32 %v217_v16, %v216_v11  ;;  %v436_v11 = vrot.slane %v404_v3, 4 }
 0x25b   :  { %v229_v22 = vrot.slane %v218_v17, 6  ;;  %v459_v37 = vmul.f32 %v436_v11, %v755_v33 }
 0x25d   :  { %v234_v27 = vsel %vm83_vm0, %v215_v21, %v229_v22  ;;  %v438_v21 = vmul.f32 %v436_v11, %v743_v20  ;;  %v461_v46 = vrot.slane %v459_v37, 4 }
 0x25e   :  { %v236_v28 = vmul.f32 0.5, %v234_v27 }
 0x25f   :  { %v440_v31 = vrot.slane %v438_v21, 4 }
 0x260   :  { %553 = vtanh.f32 %v236_v28 }
 0x261   :  { %v442_v43 = vadd.f32 %v440_v31, %v405_v36 }
 0x263   :  { %v463_v57 = vadd.f32 %v461_v46, %v442_v43 }
 0x26a   :  { %v554_v61 = vpop.eup %553 }
 0x26b   :  { %v240_v0 = vmul.f32 0.5, %v554_v61 }
 0x26d   :  { %v242_v7 = vadd.f32 0.5, %v240_v0 }
 0x26f   :  { %v255_v9 = vrot.slane %v242_v7, 6  ;;  %v258_v50 = vrot.slane %v242_v7, 2 }
 0x271   :  { %v257_v12 = vsel %vm83_vm0, %v242_v7, %v255_v9  ;;  %v260_v13 = vsel %vm83_vm0, %v258_v50, %v242_v7 }
 0x272   :  { %v415_v16 = vmul.f32 %v772_v56, %v257_v12  ;;  %v429_v17 = vmul.f32 %v779_v59, %v260_v13  ;;  %v339_v59 = vmul.f32 %v338_v18, %v743_v20 }
 0x274   :  { %v419_v22 = vmul.f32 %v417_v51, %v415_v16  ;;  %v430_v23 = vmul.f32 %v429_v17, %v428_v52 }
 0x276   :  { %v420_v27 = vadd.f32 %v419_v22, %v749_v26  ;;  %v431_v28 = vadd.f32 %v430_v23, %v749_v26  ;;  %v422_v29 = vadd.f32 %v419_v22, %v337_v8  ;;  %v433_v56 = vadd.f32 %v430_v23, %v346_v10 }
 0x278   :  { %v421_v6 = vmul.f32 %v420_v27, %v755_v33  ;;  %v432_v32 = vmul.f32 %v431_v28, %v755_v33  ;;  %v444_v34 = vrot.slane %v422_v29, 4  ;;  %v452_v35 = vrot.slane %v433_v56, 4 }
 0x27a   :  { %v423_v38 = vadd.f32 %v421_v6, %v339_v59  ;;  %v434_v39 = vadd.f32 %v432_v32, %v348_v30  ;;  %v446_v26 = vmul.f32 %v444_v34, %v743_v20  ;;  %v454_v40 = vmul.f32 %v452_v35, %v743_v20 }
 0x27b   :  { %v464_v41 = vmul.f32 %v444_v34, %v755_v33  ;;  %v469_v42 = vmul.f32 %v452_v35, %v755_v33 }
 0x27c   :  { %v448_v44 = vrot.slane %v446_v26, 4  ;;  %v456_v45 = vrot.slane %v454_v40, 4 }
 0x27d   :  { %v466_v54 = vrot.slane %v464_v41, 4  ;;  %v471_v55 = vrot.slane %v469_v42, 4 }
 0x27e   :  { %v450_v47 = vadd.f32 %v448_v44, %v423_v38  ;;  %v458_v53 = vadd.f32 %v456_v45, %v434_v39 }
 0x280   :  { %v468_v58 = vadd.f32 %v466_v54, %v450_v47  ;;  %v473_v60 = vadd.f32 %v471_v55, %v458_v53 }
 0x282   :  { %v474_v48 = vadd.f32 %v468_v58, %v463_v57 }
 0x284   :  { %v475_v49 = vadd.f32 %v474_v48, %v473_v60 }
 0x286   :  { %v476_v61 = vmul.f32 0.33333334, %v475_v49 }
 0x288   :  { %555 = vtanh.f32 %v476_v61 }
 0x292   :  { %v556_v20 = vpop.eup %555 }
 0x293   :  { %478 = vst [vmem:[#allocation8] sm:$0xf] %v556_v20 }
 0x294   :  { %634 = shalt.err (!%p631_p0)
}
 0x295   :  { %s635_s20 = scalar_lea.hbm %s868_s4, 64 }
 0x296   :  { %p636_p1 = scmp.ne.s32.totalorder %s868_s4, %s635_s20  ;;  %p639_p2 = scmp.lt.u32.totalorder %s635_s20, %s868_s4 }
 0x298   :  { %p641_p3 = pnand %p639_p2, %p636_p1 }
 0x29a   :  { %644 = shalt.err (!%p641_p3)
}
 0x29b   :  { %488 = dma.vmem_to_hbm [thread:$0]  %s486_s15, 64, %s868_s4, [#allocation4]  }
 0x29c   :  { %649 = dma.done.wait [#allocation4], 64  }
 0x29d   :  { %650 = vsyncadd [#allocation4], 4294967232 }
 0x29e   :  { %492 = vsyncpa [#allocation3], 1 }
 0x29f   :  { %493 = vsyncpa [#allocation6], 1 }
 0x2a0   :  { %494 = vsyncpa [#allocation4], 1 }

</bundles_post_ra>
